<compile_context>
chip_gen: v5e
topology: v5e:2x2
jax: 0.10.0
libtpu: 0.0.40
codegen_flags: <defaults>
</compile_context>

<pallas_src>
import numpy as np
import jax
import jax.numpy as jnp
from jax.experimental import pallas as pl
from jax.experimental.pallas import tpu as pltpu


# ---------------------------------------------------------------------------
# Host-side construction of the banded blur/subsample matrices
# ---------------------------------------------------------------------------
def _gaussian_1d(scale):
    """1D factor of the normalized 2D Gaussian buffer in AntiAliasInterpolation2d."""
    sigma = (1.0 / scale - 1.0) / 2.0
    ks = 2 * round(sigma * 4) + 1
    ka = ks // 2
    mean = (ks - 1) / 2.0
    ax = np.arange(ks, dtype=np.float64)
    g = np.exp(-((ax - mean) ** 2) / (2.0 * sigma ** 2))
    g = g / g.sum()            # outer(g, g) == PyTorch's kernel / kernel.sum()
    return g.astype(np.float32), ka


def _band_matrix(g, ka, in_size, stride):
    """(out, in) banded matrix folding zero-pad + K-tap blur + ::stride subsample."""
    K = g.shape[0]
    out_size = -(-in_size // stride)          # == len(range(0, in_size, stride))
    M = np.zeros((out_size, in_size), np.float32)
    for o in range(out_size):
        for i in range(K):
            idx = o * stride + i - ka         # index into the *unpadded* input
            if 0 <= idx < in_size:
                M[o, idx] += g[i]
    return M


def _round_up(v, m):
    return -(-v // m) * m


def _build_mats(scales, C, H, W):
    """Build padded Gv (block-diag over channels) and a scale-fused GhT_all."""
    H_pad = _round_up(H, 8)                   # sublane tile for f32 (R8)
    infos, ght_cols, col_off = [], [], 0
    for scale in scales:
        g, ka = _gaussian_1d(scale)
        s = int(1.0 / scale)                  # FOMM: ::int(1/scale)
        gv = _band_matrix(g, ka, H, s)        # (H_out, H)
        ght = _band_matrix(g, ka, W, s).T     # (W, W_out)
        h_out, w_out = gv.shape[0], ght.shape[1]
        h_out_p = _round_up(h_out, 8)         # sublane-dense rows (R7/R8)
        w_out_p = _round_up(w_out, 128)       # lane-dense columns (R7)
        gv_p = np.zeros((h_out_p, H_pad), np.float32)
        gv_p[:h_out, :H] = gv
        ght_p = np.zeros((W, w_out_p), np.float32)
        ght_p[:, :w_out] = ght
        gvbd = np.kron(np.eye(C, dtype=np.float32), gv_p)   # (C*h_out_p, C*H_pad) (R2)
        infos.append(dict(scale=scale, h_out=h_out, w_out=w_out,
                          h_out_p=h_out_p, w_out_p=w_out_p,
                          col_off=col_off, gvbd=gvbd))
        ght_cols.append(ght_p)
        col_off += w_out_p
    ght_all = np.concatenate(ght_cols, axis=1)               # (W, sum w_out_p) (R1)
    return H_pad, ght_all, infos


# ---------------------------------------------------------------------------
# Kernel
# ---------------------------------------------------------------------------
def _make_kernel(b_blk, C, H_pad, W, infos, compute_dtype):
    n_s = len(infos)

    def kernel(ght_all_ref, *refs):
        gvbd_refs = refs[:n_s]
        x_ref = refs[n_s]                     # (b_blk, C, H_pad, W)
        o_refs = refs[n_s + 1:]               # one (b_blk, C, h_out_p, w_out_p) per scale

        # Layout-preserving merge (H_pad % 8 == 0); cast feeds the bf16 MXU path.
        x2d = x_ref[...].reshape(b_blk * C * H_pad, W).astype(compute_dtype)

        # (R1) One fused horizontal blur + column-subsample for ALL scales,
        # channels, rows and images in the block: lane-dense, LHS read once.
        t_all = jnp.dot(x2d, ght_all_ref[...], preferred_element_type=jnp.float32)

        for si, info in enumerate(infos):
            off, w_p, h_p = info['col_off'], info['w_out_p'], info['h_out_p']
            # 128-aligned lane slice -> no relayout.
            t_s = t_all[:, off:off + w_p].astype(compute_dtype)
            t_s = t_s.reshape(b_blk, C * H_pad, w_p)
            gvbd = gvbd_refs[si][...]
            for b in range(b_blk):
                # (R2) Vertical blur + row-subsample for all channels of one
                # image in a single MXU call via kron(I_C, Gv).
                y = jnp.dot(gvbd, t_s[b], preferred_element_type=jnp.float32)
                o_refs[si][b] = y.reshape(C, h_p, w_p).astype(o_refs[si].dtype)

    return kernel


# ---------------------------------------------------------------------------
# Wrapper
# ---------------------------------------------------------------------------
def _fused_pyramid(x, scales_nonunit, compute_dtype, single_buffer_consts):
    """One pallas_call computing every non-unity scale; x is read from HBM once."""
    N, C, H, W = x.shape
    out_dtype = x.dtype
    H_pad, ght_all_np, infos = _build_mats(scales_nonunit, C, H, W)

    # (R5/R6) narrow the streamed image to the MXU input dtype.
    x_in = x.astype(compute_dtype)
    if H_pad != H:                            # (R8) zero rows x zero Gv cols = 0
        x_in = jnp.pad(x_in, ((0, 0), (0, 0), (0, H_pad - H), (0, 0)))

    # ---- (R3/R4) batch blocking sized against a v7x-safe VMEM budget --------
    itm = jnp.dtype(compute_dtype).itemsize
    bytes_per_img = C * H_pad * (2 * W * itm          # double-buffered input block
                                 + ght_all_np.shape[1] * 4)   # fused intermediate
    for info in infos:
        bytes_per_img += 4 * 2 * C * info['h_out_p'] * info['w_out_p']  # dbuf outputs
    budget = 20 * 2 ** 20                     # conservative for v7x's 64 MiB VMEM
    b_blk = max(1, min(N, 8, budget // max(bytes_per_img, 1)))
    grid_n = pl.cdiv(N, b_blk)
    if grid_n % 2 == 1 and grid_n < N:        # keep both v7x TensorCores busy
        grid_n += 1
        b_blk = -(-N // grid_n)
        grid_n = pl.cdiv(N, b_blk)
    n_padded = grid_n * b_blk
    if n_padded != N:
        x_in = jnp.pad(x_in, ((0, n_padded - N), (0, 0), (0, 0), (0, 0)))

    consts = [jnp.asarray(ght_all_np, dtype=compute_dtype)]
    consts += [jnp.asarray(info['gvbd'], dtype=compute_dtype) for info in infos]

    def _const_spec(shape):
        if single_buffer_consts:
            # (R8) constants never change block index -> single buffer saves VMEM.
            return pl.BlockSpec(shape, lambda i: (0,) * len(shape),
                                pipeline_mode=pl.Buffered(1))
        return pl.BlockSpec(shape, lambda i: (0,) * len(shape))

    in_specs = [_const_spec(c.shape) for c in consts]
    in_specs.append(pl.BlockSpec((b_blk, C, H_pad, W), lambda i: (i, 0, 0, 0)))

    out_shapes = tuple(
        jax.ShapeDtypeStruct((n_padded, C, info['h_out_p'], info['w_out_p']),
                             out_dtype) for info in infos)
    out_specs = tuple(
        pl.BlockSpec((b_blk, C, info['h_out_p'], info['w_out_p']),
                     lambda i: (i, 0, 0, 0)) for info in infos)

    const_bytes = sum(int(c.size) * c.dtype.itemsize for c in consts)
    vmem_limit = int(min(48 * 2 ** 20,
                         max(16 * 2 ** 20, 2 * (b_blk * bytes_per_img + const_bytes))))

    kernel = _make_kernel(b_blk, C, H_pad, W, infos, compute_dtype)
    outs = pl.pallas_call(
        kernel,
        out_shape=out_shapes,
        grid=(grid_n,),
        in_specs=in_specs,
        out_specs=out_specs,
        compiler_params=pltpu.CompilerParams(
            dimension_semantics=("parallel",),   # batch blocks are independent
            vmem_limit_bytes=vmem_limit),
    )(*consts, x_in)
    if not isinstance(outs, (tuple, list)):
        outs = (outs,)
    # (R7) strip batch / sublane / lane padding back off (wrapper plumbing).
    return tuple(o[:N, :, :info['h_out'], :info['w_out']]
                 for o, info in zip(outs, infos))


def image_pyramide(x, scales, compute_dtype=jnp.bfloat16):
    """ImagePyramide.forward: dict of anti-aliased downsampled images (NCHW)."""
    out_dict = {}
    blur_scales = []
    for scale in scales:
        if scale == 1.0:
            out_dict['prediction_' + str(scale)] = x      # identity, no kernel
        else:
            blur_scales.append(scale)
    if blur_scales:
        try:
            outs = _fused_pyramid(x, blur_scales, compute_dtype,
                                  single_buffer_consts=True)
        except Exception:
            # pl.Buffered(1) not supported on this JAX build -> default buffering.
            outs = _fused_pyramid(x, blur_scales, compute_dtype,
                                  single_buffer_consts=False)
        for scale, o in zip(blur_scales, outs):
            out_dict['prediction_' + str(scale)] = o
    return out_dict


# ---------------------------------------------------------------------------
# Pure-JAX reference (pad + depthwise 2D conv + ::s slice), mirrors PyTorch
# ---------------------------------------------------------------------------
def _reference_pyramide(x, scales, num_channels):
    out = {}
    for scale in scales:
        if scale == 1.0:
            out['prediction_' + str(scale)] = x
            continue
        sigma = (1.0 / scale - 1.0) / 2.0
        ks = 2 * round(sigma * 4) + 1
        ka = ks // 2
        kb = ka - 1 if ks % 2 == 0 else ka
        mean = (ks - 1) / 2.0
        ax = np.arange(ks, dtype=np.float32)
        g = np.exp(-((ax - mean) ** 2) / (2.0 * sigma ** 2))
        k2 = np.outer(g, g)
        k2 = (k2 / k2.sum()).astype(np.float32)
        w = jnp.asarray(np.tile(k2[None, None], (num_channels, 1, 1, 1)))
        xp = jnp.pad(x, ((0, 0), (0, 0), (ka, kb), (ka, kb)))
        y = jax.lax.conv_general_dilated(
            xp, w, window_strides=(1, 1), padding='VALID',
            dimension_numbers=('NCHW', 'OIHW', 'NCHW'),
            feature_group_count=num_channels)
        s = int(1.0 / scale)
        out['prediction_' + str(scale)] = y[:, :, ::s, ::s]
    return out


if __name__ == "__main__":
    scales = [1.0, 0.5, 0.25]
    num_channels = 3
    key = jax.random.PRNGKey(0)
    x = jax.random.normal(key, (2, num_channels, 16, 16), dtype=jnp.float32)

    ref = _reference_pyramide(x, scales, num_channels)

    # Exact path (f32 MXU operands): tight tolerance.
    out_f32 = image_pyramide(x, scales, compute_dtype=jnp.float32)
    out_f32 = jax.tree_util.tree_map(jax.block_until_ready, out_f32)
    for k in ref:
        assert out_f32[k].shape == ref[k].shape, (k, out_f32[k].shape, ref[k].shape)
        np.testing.assert_allclose(np.asarray(out_f32[k]), np.asarray(ref[k]),
                                   rtol=1e-5, atol=1e-5)

    # Fast path (bf16 MXU operands, f32 accumulate) -- the default; looser
    # tolerance is the deliberate precision/perf trade from the review.
    out_bf16 = image_pyramide(x, scales, compute_dtype=jnp.bfloat16)
    out_bf16 = jax.tree_util.tree_map(jax.block_until_ready, out_bf16)
    for k in ref:
        assert out_bf16[k].shape == ref[k].shape, (k, out_bf16[k].shape, ref[k].shape)
        np.testing.assert_allclose(np.asarray(out_bf16[k]), np.asarray(ref[k]),
                                   rtol=3e-2, atol=3e-2)

    print("KERNEL_OK")
</pallas_src>

<mosaic_0001>
module attributes {stable_mosaic.version = 11 : i64} {
  func.func @kernel(%arg0: i32, %arg1: memref<16x256xf32, #tpu.memory_space<vmem>>, %arg2: memref<24x48xf32, #tpu.memory_space<vmem>>, %arg3: memref<24x48xf32, #tpu.memory_space<vmem>>, %arg4: memref<1x3x16x16xf32, #tpu.memory_space<vmem>>, %arg5: memref<1x3x8x128xf32, #tpu.memory_space<vmem>>, %arg6: memref<1x3x8x128xf32, #tpu.memory_space<vmem>>) attributes {dimension_semantics = [#tpu.dimension_semantics<parallel>], iteration_bounds = array<i64: 2>, scalar_prefetch = 0 : i64, scratch_operands = 0 : i64, tpu.core_type = #tpu.core_type<tc>, window_params = [{pipeline_mode = #tpu.pipeline_mode<synchronous>, transform_indices = @transform_0, window_bounds = array<i64: 16, 256>}, {pipeline_mode = #tpu.pipeline_mode<synchronous>, transform_indices = @transform_1, window_bounds = array<i64: 24, 48>}, {pipeline_mode = #tpu.pipeline_mode<synchronous>, transform_indices = @transform_2, window_bounds = array<i64: 24, 48>}, {transform_indices = @transform_3, window_bounds = array<i64: 1, 3, 16, 16>}, {transform_indices = @transform_4, window_bounds = array<i64: 1, 3, 8, 128>}, {transform_indices = @transform_5, window_bounds = array<i64: 1, 3, 8, 128>}]} {
    %c0 = arith.constant 0 : index
    %c0_0 = arith.constant 0 : index
    %c0_1 = arith.constant 0 : index
    %c0_2 = arith.constant 0 : index
    %0 = vector.load %arg4[%c0, %c0_0, %c0_1, %c0_2] : memref<1x3x16x16xf32, #tpu.memory_space<vmem>>, vector<1x3x16x16xf32>
    %1 = vector.shape_cast %0 : vector<1x3x16x16xf32> to vector<48x16xf32>
    %c0_3 = arith.constant 0 : index
    %c0_4 = arith.constant 0 : index
    %2 = vector.load %arg1[%c0_3, %c0_4] : memref<16x256xf32, #tpu.memory_space<vmem>>, vector<16x256xf32>
    %cst = arith.constant dense<0.000000e+00> : vector<48x256xf32>
    %3 = tpu.matmul %1, %2, %cst {dimension_numbers = #tpu.dot_dimension_numbers<[1], [0], [0], [1], [0, 0, 1, 1], [], []>} : vector<48x16xf32>, vector<16x256xf32>, vector<48x256xf32> -> vector<48x256xf32>
    %4 = vector.extract_strided_slice %3 {offsets = [0, 0], sizes = [48, 128], strides = [1, 1]} : vector<48x256xf32> to vector<48x128xf32>
    %5 = vector.shape_cast %4 : vector<48x128xf32> to vector<1x48x128xf32>
    %c0_5 = arith.constant 0 : index
    %c0_6 = arith.constant 0 : index
    %6 = vector.load %arg2[%c0_5, %c0_6] : memref<24x48xf32, #tpu.memory_space<vmem>>, vector<24x48xf32>
    %7 = vector.shape_cast %5 : vector<1x48x128xf32> to vector<48x128xf32>
    %cst_7 = arith.constant dense<0.000000e+00> : vector<24x128xf32>
    %8 = tpu.matmul %6, %7, %cst_7 {dimension_numbers = #tpu.dot_dimension_numbers<[1], [0], [0], [1], [0, 0, 1, 1], [], []>} : vector<24x48xf32>, vector<48x128xf32>, vector<24x128xf32> -> vector<24x128xf32>
    %9 = vector.shape_cast %8 : vector<24x128xf32> to vector<3x8x128xf32>
    %c0_8 = arith.constant 0 : index
    %c0_9 = arith.constant 0 : index
    %c0_10 = arith.constant 0 : index
    %c0_11 = arith.constant 0 : index
    %10 = vector.load %arg5[%c0_8, %c0_9, %c0_10, %c0_11] : memref<1x3x8x128xf32, #tpu.memory_space<vmem>>, vector<1x3x8x128xf32>
    %11 = vector.shape_cast %10 : vector<1x3x8x128xf32> to vector<3x8x128xf32>
    %12 = vector.shape_cast %9 : vector<3x8x128xf32> to vector<1x3x8x128xf32>
    tpu.vector_store %arg5[%c0_8, %c0_9, %c0_10, %c0_11], %12 {strides = array<i32>} : memref<1x3x8x128xf32, #tpu.memory_space<vmem>>, vector<1x3x8x128xf32>,
    %13 = vector.extract_strided_slice %3 {offsets = [0, 128], sizes = [48, 128], strides = [1, 1]} : vector<48x256xf32> to vector<48x128xf32>
    %14 = vector.shape_cast %13 : vector<48x128xf32> to vector<1x48x128xf32>
    %c0_12 = arith.constant 0 : index
    %c0_13 = arith.constant 0 : index
    %15 = vector.load %arg3[%c0_12, %c0_13] : memref<24x48xf32, #tpu.memory_space<vmem>>, vector<24x48xf32>
    %16 = vector.shape_cast %14 : vector<1x48x128xf32> to vector<48x128xf32>
    %cst_14 = arith.constant dense<0.000000e+00> : vector<24x128xf32>
    %17 = tpu.matmul %15, %16, %cst_14 {dimension_numbers = #tpu.dot_dimension_numbers<[1], [0], [0], [1], [0, 0, 1, 1], [], []>} : vector<24x48xf32>, vector<48x128xf32>, vector<24x128xf32> -> vector<24x128xf32>
    %18 = vector.shape_cast %17 : vector<24x128xf32> to vector<3x8x128xf32>
    %c0_15 = arith.constant 0 : index
    %c0_16 = arith.constant 0 : index
    %c0_17 = arith.constant 0 : index
    %c0_18 = arith.constant 0 : index
    %19 = vector.load %arg6[%c0_15, %c0_16, %c0_17, %c0_18] : memref<1x3x8x128xf32, #tpu.memory_space<vmem>>, vector<1x3x8x128xf32>
    %20 = vector.shape_cast %19 : vector<1x3x8x128xf32> to vector<3x8x128xf32>
    %21 = vector.shape_cast %18 : vector<3x8x128xf32> to vector<1x3x8x128xf32>
    tpu.vector_store %arg6[%c0_15, %c0_16, %c0_17, %c0_18], %21 {strides = array<i32>} : memref<1x3x8x128xf32, #tpu.memory_space<vmem>>, vector<1x3x8x128xf32>,
    return
  }
  func.func @transform_0(%arg0: i32) -> (i32, i32) {
    %c0_i32 = arith.constant 0 : i32
    %c0_i32_0 = arith.constant 0 : i32
    %c0_i32_1 = arith.constant 0 : i32
    return %c0_i32, %c0_i32_0 : i32, i32
  }
  func.func @transform_1(%arg0: i32) -> (i32, i32) {
    %c0_i32 = arith.constant 0 : i32
    %c0_i32_0 = arith.constant 0 : i32
    %c0_i32_1 = arith.constant 0 : i32
    return %c0_i32, %c0_i32_0 : i32, i32
  }
  func.func @transform_2(%arg0: i32) -> (i32, i32) {
    %c0_i32 = arith.constant 0 : i32
    %c0_i32_0 = arith.constant 0 : i32
    %c0_i32_1 = arith.constant 0 : i32
    return %c0_i32, %c0_i32_0 : i32, i32
  }
  func.func @transform_3(%arg0: i32) -> (i32, i32, i32, i32) {
    %c0_i32 = arith.constant 0 : i32
    %c0_i32_0 = arith.constant 0 : i32
    %c0_i32_1 = arith.constant 0 : i32
    %c0_i32_2 = arith.constant 0 : i32
    return %arg0, %c0_i32, %c0_i32_0, %c0_i32_1 : i32, i32, i32, i32
  }
  func.func @transform_4(%arg0: i32) -> (i32, i32, i32, i32) {
    %c0_i32 = arith.constant 0 : i32
    %c0_i32_0 = arith.constant 0 : i32
    %c0_i32_1 = arith.constant 0 : i32
    %c0_i32_2 = arith.constant 0 : i32
    return %arg0, %c0_i32, %c0_i32_0, %c0_i32_1 : i32, i32, i32, i32
  }
  func.func @transform_5(%arg0: i32) -> (i32, i32, i32, i32) {
    %c0_i32 = arith.constant 0 : i32
    %c0_i32_0 = arith.constant 0 : i32
    %c0_i32_1 = arith.constant 0 : i32
    %c0_i32_2 = arith.constant 0 : i32
    return %arg0, %c0_i32, %c0_i32_0, %c0_i32_1 : i32, i32, i32, i32
  }
}

module attributes {stable_mosaic.version = 11 : i64} {
  func.func @kernel(%arg0: i32, %arg1: memref<16x256xf32, #tpu.memory_space<vmem>>, %arg2: memref<24x48xf32, #tpu.memory_space<vmem>>, %arg3: memref<24x48xf32, #tpu.memory_space<vmem>>, %arg4: memref<1x3x16x16xf32, #tpu.memory_space<vmem>>, %arg5: memref<1x3x8x128xf32, #tpu.memory_space<vmem>>, %arg6: memref<1x3x8x128xf32, #tpu.memory_space<vmem>>) attributes {dimension_semantics = [#tpu.dimension_semantics<parallel>], iteration_bounds = array<i64: 2>, scalar_prefetch = 0 : i64, scratch_operands = 0 : i64, tpu.core_type = #tpu.core_type<tc>, window_params = [{pipeline_mode = #tpu.pipeline_mode<synchronous>, transform_indices = @transform_0, window_bounds = array<i64: 16, 256>}, {pipeline_mode = #tpu.pipeline_mode<synchronous>, transform_indices = @transform_1, window_bounds = array<i64: 24, 48>}, {pipeline_mode = #tpu.pipeline_mode<synchronous>, transform_indices = @transform_2, window_bounds = array<i64: 24, 48>}, {transform_indices = @transform_3, window_bounds = array<i64: 1, 3, 16, 16>}, {transform_indices = @transform_4, window_bounds = array<i64: 1, 3, 8, 128>}, {transform_indices = @transform_5, window_bounds = array<i64: 1, 3, 8, 128>}]} {
    %c0 = arith.constant 0 : index
    %c0_0 = arith.constant 0 : index
    %c0_1 = arith.constant 0 : index
    %c0_2 = arith.constant 0 : index
    %0 = vector.load %arg4[%c0, %c0_0, %c0_1, %c0_2] : memref<1x3x16x16xf32, #tpu.memory_space<vmem>>, vector<1x3x16x16xf32>
    %1 = vector.shape_cast %0 : vector<1x3x16x16xf32> to vector<48x16xf32>
    %c0_3 = arith.constant 0 : index
    %c0_4 = arith.constant 0 : index
    %2 = vector.load %arg1[%c0_3, %c0_4] : memref<16x256xf32, #tpu.memory_space<vmem>>, vector<16x256xf32>
    %cst = arith.constant dense<0.000000e+00> : vector<48x256xf32>
    %3 = tpu.matmul %1, %2, %cst {dimension_numbers = #tpu.dot_dimension_numbers<[1], [0], [0], [1], [0, 0, 1, 1], [], []>} : vector<48x16xf32>, vector<16x256xf32>, vector<48x256xf32> -> vector<48x256xf32>
    %4 = vector.extract_strided_slice %3 {offsets = [0, 0], sizes = [48, 128], strides = [1, 1]} : vector<48x256xf32> to vector<48x128xf32>
    %5 = vector.shape_cast %4 : vector<48x128xf32> to vector<1x48x128xf32>
    %c0_5 = arith.constant 0 : index
    %c0_6 = arith.constant 0 : index
    %6 = vector.load %arg2[%c0_5, %c0_6] : memref<24x48xf32, #tpu.memory_space<vmem>>, vector<24x48xf32>
    %7 = vector.shape_cast %5 : vector<1x48x128xf32> to vector<48x128xf32>
    %cst_7 = arith.constant dense<0.000000e+00> : vector<24x128xf32>
    %8 = tpu.matmul %6, %7, %cst_7 {dimension_numbers = #tpu.dot_dimension_numbers<[1], [0], [0], [1], [0, 0, 1, 1], [], []>} : vector<24x48xf32>, vector<48x128xf32>, vector<24x128xf32> -> vector<24x128xf32>
    %9 = vector.shape_cast %8 : vector<24x128xf32> to vector<3x8x128xf32>
    %c0_8 = arith.constant 0 : index
    %c0_9 = arith.constant 0 : index
    %c0_10 = arith.constant 0 : index
    %c0_11 = arith.constant 0 : index
    %10 = vector.load %arg5[%c0_8, %c0_9, %c0_10, %c0_11] : memref<1x3x8x128xf32, #tpu.memory_space<vmem>>, vector<1x3x8x128xf32>
    %11 = vector.shape_cast %10 : vector<1x3x8x128xf32> to vector<3x8x128xf32>
    %12 = vector.shape_cast %9 : vector<3x8x128xf32> to vector<1x3x8x128xf32>
    tpu.vector_store %arg5[%c0_8, %c0_9, %c0_10, %c0_11], %12 {strides = array<i32>} : memref<1x3x8x128xf32, #tpu.memory_space<vmem>>, vector<1x3x8x128xf32>,
    %13 = vector.extract_strided_slice %3 {offsets = [0, 128], sizes = [48, 128], strides = [1, 1]} : vector<48x256xf32> to vector<48x128xf32>
    %14 = vector.shape_cast %13 : vector<48x128xf32> to vector<1x48x128xf32>
    %c0_12 = arith.constant 0 : index
    %c0_13 = arith.constant 0 : index
    %15 = vector.load %arg3[%c0_12, %c0_13] : memref<24x48xf32, #tpu.memory_space<vmem>>, vector<24x48xf32>
    %16 = vector.shape_cast %14 : vector<1x48x128xf32> to vector<48x128xf32>
    %cst_14 = arith.constant dense<0.000000e+00> : vector<24x128xf32>
    %17 = tpu.matmul %15, %16, %cst_14 {dimension_numbers = #tpu.dot_dimension_numbers<[1], [0], [0], [1], [0, 0, 1, 1], [], []>} : vector<24x48xf32>, vector<48x128xf32>, vector<24x128xf32> -> vector<24x128xf32>
    %18 = vector.shape_cast %17 : vector<24x128xf32> to vector<3x8x128xf32>
    %c0_15 = arith.constant 0 : index
    %c0_16 = arith.constant 0 : index
    %c0_17 = arith.constant 0 : index
    %c0_18 = arith.constant 0 : index
    %19 = vector.load %arg6[%c0_15, %c0_16, %c0_17, %c0_18] : memref<1x3x8x128xf32, #tpu.memory_space<vmem>>, vector<1x3x8x128xf32>
    %20 = vector.shape_cast %19 : vector<1x3x8x128xf32> to vector<3x8x128xf32>
    %21 = vector.shape_cast %18 : vector<3x8x128xf32> to vector<1x3x8x128xf32>
    tpu.vector_store %arg6[%c0_15, %c0_16, %c0_17, %c0_18], %21 {strides = array<i32>} : memref<1x3x8x128xf32, #tpu.memory_space<vmem>>, vector<1x3x8x128xf32>,
    return
  }
  func.func @transform_0(%arg0: i32) -> (i32, i32) {
    %c0_i32 = arith.constant 0 : i32
    %c0_i32_0 = arith.constant 0 : i32
    %c0_i32_1 = arith.constant 0 : i32
    return %c0_i32, %c0_i32_0 : i32, i32
  }
  func.func @transform_1(%arg0: i32) -> (i32, i32) {
    %c0_i32 = arith.constant 0 : i32
    %c0_i32_0 = arith.constant 0 : i32
    %c0_i32_1 = arith.constant 0 : i32
    return %c0_i32, %c0_i32_0 : i32, i32
  }
  func.func @transform_2(%arg0: i32) -> (i32, i32) {
    %c0_i32 = arith.constant 0 : i32
    %c0_i32_0 = arith.constant 0 : i32
    %c0_i32_1 = arith.constant 0 : i32
    return %c0_i32, %c0_i32_0 : i32, i32
  }
  func.func @transform_3(%arg0: i32) -> (i32, i32, i32, i32) {
    %c0_i32 = arith.constant 0 : i32
    %c0_i32_0 = arith.constant 0 : i32
    %c0_i32_1 = arith.constant 0 : i32
    %c0_i32_2 = arith.constant 0 : i32
    return %arg0, %c0_i32, %c0_i32_0, %c0_i32_1 : i32, i32, i32, i32
  }
  func.func @transform_4(%arg0: i32) -> (i32, i32, i32, i32) {
    %c0_i32 = arith.constant 0 : i32
    %c0_i32_0 = arith.constant 0 : i32
    %c0_i32_1 = arith.constant 0 : i32
    %c0_i32_2 = arith.constant 0 : i32
    return %arg0, %c0_i32, %c0_i32_0, %c0_i32_1 : i32, i32, i32, i32
  }
  func.func @transform_5(%arg0: i32) -> (i32, i32, i32, i32) {
    %c0_i32 = arith.constant 0 : i32
    %c0_i32_0 = arith.constant 0 : i32
    %c0_i32_1 = arith.constant 0 : i32
    %c0_i32_2 = arith.constant 0 : i32
    return %arg0, %c0_i32, %c0_i32_0, %c0_i32_1 : i32, i32, i32, i32
  }
}

</mosaic_0001>

<bundles_post_ra>
// kernel: tpu_custom_call.1
= control target key start
LH: loop header
LB: loop body
LE: loop exit
PB: predicated region body
PF: predicated region fallthrough
CT: control target
= control target key end

     0   :  { %s1258_s0 = inlined_call_operand.hbm [shape: f32[16,256], index: 0, kind: input, shape index: {}]   ;;  %s1259_s1 = inlined_call_operand.hbm [shape: f32[24,48], index: 1, kind: input, shape index: {}]   ;;  %s1260_s2 = inlined_call_operand.hbm [shape: f32[24,48], index: 2, kind: input, shape index: {}]   ;;  %s1261_s3 = inlined_call_operand.hbm [shape: f32[2,3,16,16], index: 3, kind: input, shape index: {}]   ;;  %s1262_s4 = inlined_call_operand.hbm [shape: f32[2,3,8,128], index: 4, kind: output, shape index: {0}]   ;;  %s1263_s5 = inlined_call_operand.hbm [shape: f32[2,3,8,128], index: 5, kind: output, shape index: {1}]  }
   0x1   :  { %1266 = sst [smem:[#allocation18_spill]] %s1258_s0 }
   0x2   :  { %11 = vsyncpa [#allocation3], 0 }
   0x3   :  { %12 = vsyncpa [#allocation6], 0 }
   0x4   :  { %13 = vsyncpa [#allocation9], 0 }
   0x5   :  { %15 = vsyncpa [#allocation9 + $0x1], 0 }
   0x6   :  { %16 = vsyncpa [#allocation4], 0 }
   0x7   :  { %18 = vsyncpa [#allocation4 + $0x1], 0 }
   0x8   :  { %19 = vsyncpa [#allocation12], 0 }
   0x9   :  { %21 = vsyncpa [#allocation12 + $0x1], 0  ;;  %s1057_s18 = smov 0   ;;  %s1059_s19 = smov 0  }
   0xa   :  { %s1061_s20 = smov 0   ;;  %s1063_s21 = smov 0  }
   0xb LB: > { %s1078_s22 = sadd.s32 4294967295, %s1016_s21   ;;  %s663_s23 = sadd.s32 4294967294, %s1016_s21   ;;  %s1016_s21 = sphi %s1063_s21, %s1280_s21   ;;  %s1012_s20 = sphi %s1061_s20, %s1279_s20   ;;  %s1008_s19 = sphi %s1059_s19, %s1278_s19   ;;  %s1004_s18 = sphi %s1057_s18, %s1277_s18  }
   0xc   : > { %p110_p0 = scmp.ne.s32.totalorder %s1008_s19, %s1004_s18  ;;  %p111_p1 = scmp.eq.s32.totalorder %s1078_s22, 0 }
   0xd   : > { %p134_p2 = scmp.eq.s32.totalorder %s1078_s22, 1  ;;  %p140_p3 = scmp.eq.s32.totalorder %s663_s23, 1 }
   0xe   : > { %p1087_p4 = por %p111_p1, %p110_p0  ;;  %p664_p5 = scmp.ge.s32.totalorder %s1016_s21, 1 }
   0xf   : > { %p1092_p6 = por %p140_p3, %p110_p0  ;;  %p173_p7 = scmp.lt.s32.totalorder %s1016_s21, 3 }
  0x10   : > { %s198_s28 = sshll.u32 %s1259_s1, 4  ;;  %s1018_s30 = smov [#allocation5]   ;;  %s199_s28 = int_to_ptr.hbm [resolvable:$true] %s198_s28 }
  0x11   : > { %p1100_p8 = pnand %p664_p5, %p173_p7  ;;  %s200_s6 = sshll.u32 %s1018_s30, 4  ;;  %s201_s6 = int_to_ptr.vmem [resolvable:$true] %s200_s6 }
  0x12   : > { %s1271_s0 = sld [smem:[#allocation18_spill]]  ;;  %s1264_s11 = smov 128  }
  0x13   : > { %p720_p9 = pneg %p1100_p8  ;;  %s1265_s12 = smov 8  }
  0x14   : > { %s1021_s13 = smov [#allocation2]   ;;  %s1022_s15 = smov 256  }
  0x15   : > { %p1108_p10 = pnand %p720_p9, %p111_p1  ;;  %s186_s14 = sshll.u32 %s1021_s13, 4  ;;  %s187_s14 = int_to_ptr.vmem [resolvable:$true] %s186_s14 }
  0x16   : > { %s1023_s16 = smov 16   ;;  %s212_s26 = sshll.u32 %s1260_s2, 4  ;;  %s213_s26 = int_to_ptr.hbm [resolvable:$true] %s212_s26 }
  0x17   : > { %726 = dma.hbm_to_vmem [thread:$0]  (!%p1108_p10), %s199_s28, 384, %s201_s6, [#allocation6], %s1264_s11, %s1264_s11, %s1265_s12  }
  0x18   : > { %s184_s10 = sshll.u32 %s1271_s0, 4  ;;  %s1024_s27 = smov [#allocation7]   ;;  %s185_s10 = int_to_ptr.hbm [resolvable:$true] %s184_s10 }
  0x19   : > { %723 = dma.hbm_to_vmem [thread:$0]  (!%p1108_p10), %s185_s10, 512, %s187_s14, [#allocation3], %s1022_s15, %s1022_s15, %s1023_s16  }
  0x1a   : > { %s214_s28 = sshll.u32 %s1024_s27, 4  ;;  %s1132_s30 = sadd.s32 1, %s1016_s21   ;;  %s215_s28 = int_to_ptr.vmem [resolvable:$true] %s214_s28 }
  0x1b   : > { %729 = dma.hbm_to_vmem [thread:$0]  (!%p1108_p10), %s213_s26, 384, %s215_s28, [#allocation6], %s1264_s11, %s1264_s11, %s1265_s12  }
  0x1c   : > { %s94_s6 = ssub.s32 %s1016_s21, %s1132_s30  ;;  %s97_s8 = sadd.s32 1, %s1012_s20 }
  0x1d   : > { %p95_p12 = scmp.eq.s32.totalorder %s94_s6, 0  ;;  %p104_p13 = scmp.ne.s32.totalorder %s1012_s20, %s1008_s19 }
  0x1e   : > { %p105_p0 = scmp.eq.s32.totalorder %s1016_s21, 0  ;;  %p744_p3 = scmp.lt.s32.totalorder %s1016_s21, 2 }
  0x1f   : > { %s1142_s9 = scalar_select %p95_p12, %s1012_s20, %s97_s8  }
  0x20   : > { %p106_p5 = por %p105_p0, %p104_p13  ;;  %p1146_p7 = por %p134_p2, %p104_p13 }
  0x21   : > { %s228_s7 = sand.u32 1, %s1012_s20   ;;  %s697_s13 = smul.u32 48, %s1016_s21 }
  0x22   : > { %s696_s14 = smul.u32 48, %s228_s7  ;;  %p1155_p9 = pnand %p744_p3, %p106_p5 }
  0x23   : > { %s237_s17 = scalar_lea.hbm %s1261_s3, %s697_s13  ;;  %s229_s6 = scalar_lea.sflag [#allocation9], %s228_s7 }
  0x24   : > { %s238_s26 = sshll.u32 %s237_s17, 4  ;;  %s232_s27 = scalar_lea.vmem [#allocation8], %s696_s14  ;;  %s239_s26 = int_to_ptr.hbm [resolvable:$true] %s238_s26 }
  0x25   : > { %s240_s28 = sshll.u32 %s232_s27, 4  ;;  %s880_s8 = sshra.s32 %s239_s26, 4  ;;  %s241_s28 = int_to_ptr.vmem [resolvable:$true] %s240_s28  ;;  %s881_s8 = int_to_ptr.hbm [resolvable:$true] %s880_s8 }
  0x26   : > { %s882_s11 = scalar_lea.hbm %s881_s8, 48  ;;  %p884_p10 = pneg %p1155_p9 }
  0x27   : > { %p883_p2 = scmp.ne.s32.totalorder %s881_s8, %s882_s11  ;;  %s887_s16 = scalar_lea.hbm %s1261_s3, 96 }
  0x28   : > { %p888_p0 = scmp.lt.s32.totalorder %s881_s8, %s1261_s3  ;;  %p889_p3 = scmp.lt.s32.totalorder %s887_s16, %s882_s11 }
  0x29   : > { %p885_p12 = pnand %p884_p10, %p883_p2 }
  0x2a   : > { %p890_p5 = por %p889_p3, %p888_p0 }
  0x2b   : > { %p886_p13 = pneg %p885_p12 }
  0x2d   : > { %p891_p11 = pnand %p890_p5, %p886_p13 }
  0x2f   : > { %894 = shalt.err (!%p891_p11)
}
  0x30   : > { %s1274_s7 = smov 8   ;;  %s1275_s14 = smov 128  }
  0x31   : > { %733 = dma.hbm_to_vmem [thread:$0]  (!%p1155_p9), %s239_s26, 768, %s241_s28, %s229_s6, %s1275_s14, %s1275_s14, %s1274_s7  }
  0x32   : > { %252 = sbr.rel (%p1100_p8) target bundleno = 409 (0x199), region = 36 }
  0x37   : > { %983 = dma.done.wait (%p111_p1), [#allocation3], 512  }
  0x38   : > { %985 = vsyncadd (%p111_p1), [#allocation3], 4294966784 }
  0x39   : > { %987 = dma.done.wait (%p111_p1), [#allocation6], 768  }
  0x3a   : > { %989 = vsyncadd (%p111_p1), [#allocation6], 4294966528  ;;  %s1183_s0 = sand.u32 1, %s1008_s19  }
  0x3b   : > { %s698_s29 = smul.u32 48, %s1183_s0  ;;  %s270_s11 = scalar_lea.sflag [#allocation9], %s1183_s0 }
  0x3d   : > { %s273_s12 = scalar_lea.vmem [#allocation8], %s698_s29 }
  0x3e   : > { %991 = dma.done.wait (%p1087_p4), %s270_s11, 768  }
  0x3f   : > { %993 = vsyncadd (%p1087_p4), %s270_s11, 4294966528  ;;  %v314_v0 = vld [vmem:[#allocation2 + $0x10] sm:$0xff]  ;;  %v315_v1 = vld [vmem:[#allocation2 + $0x18] sm:$0xff]  ;;  %vm316_vm0 = vcmask 130048   ;;  %vm408_vm1 = vcmask 392192   ;;  %s699_s24 = smul.u32 24, %s1183_s0 }
  0x40   : > { %v312_v2 = vld [vmem:[#allocation2] sm:$0xff]  ;;  %349 = vmatpush.msra.mxu0 %v314_v0  ;;  %384 = vmatpush.msra.mxu1 %v315_v1  ;;  %v313_v3 = vld [vmem:[#allocation2 + $0x8] sm:$0xff]  ;;  %v447_v23 = vld [vmem:[#allocation7] sm:$0xff]  ;;  %s700_s26 = smul.u32 24, %s1078_s22  ;;  %s489_s29 = scalar_lea.sflag [#allocation4], %s1183_s0 }
  0x41   : > { %v306_v4 = vld [vmem:[%s273_s12] sm:$0xff]  ;;  %v307_v5 = vld [vmem:[%s273_s12 + $0x8] sm:$0xff]  ;;  %v308_v6 = vld [vmem:[%s273_s12 + $0x10] sm:$0xff]  ;;  %s298_s17 = scalar_lea.vmem [#allocation10], %s699_s24  ;;  %s305_s23 = scalar_lea.vmem [#allocation11], %s699_s24 }
  0x42   : > { %350 = vmatpush.msra.mxu0 %v312_v2  ;;  %385 = vmatpush.msra.mxu1 %v313_v3  ;;  %v309_v7 = vld [vmem:[%s273_s12 + $0x18] sm:$0xff]  ;;  %v310_v8 = vld [vmem:[%s273_s12 + $0x20] sm:$0xff]  ;;  %v311_v9 = vld [vmem:[%s273_s12 + $0x28] sm:$0xff]  ;;  %s505_s6 = scalar_lea.hbm %s1262_s4, %s700_s26  ;;  %s506_s8 = sshll.u32 %s298_s17, 4  ;;  %s507_s8 = int_to_ptr.vmem [resolvable:$true] %s506_s8 }
  0x43   : > { %674 = vmatmul.msk.f32.vlgmr.msra.gmra.mxu0 %vm316_vm0, %v306_v4  ;;  %680 = vmatmul.msk.f32.vlgmr.msra.gmra.mxu1 %vm316_vm0, %v306_v4  ;;  %v405_v22 = vld [vmem:[#allocation5] sm:$0xff]  ;;  %v406_v24 = vld [vmem:[#allocation5 + $0x8] sm:$0xff]  ;;  %v407_v26 = vld [vmem:[#allocation5 + $0x10] sm:$0xff]  ;;  %s523_s13 = sshll.u32 %s305_s23, 4  ;;  %s522_s7 = scalar_lea.hbm %s1263_s5, %s700_s26  ;;  %s1211_s13 = int_to_ptr.vmem [resolvable:$true] %s523_s13 }
  0x44   : > { %v448_v25 = vld [vmem:[#allocation7 + $0x8] sm:$0xff]  ;;  %v449_v27 = vld [vmem:[#allocation7 + $0x10] sm:$0xff]  ;;  %s508_s14 = sshll.u32 %s505_s6, 4  ;;  %s525_s22 = sshll.u32 %s522_s7, 4  ;;  %s509_s14 = int_to_ptr.hbm [resolvable:$true] %s508_s14  ;;  %s1213_s22 = int_to_ptr.hbm [resolvable:$true] %s525_s22 }
  0x45   : > { %s924_s11 = sshra.s32 %s509_s14, 4  ;;  %s930_s27 = scalar_lea.hbm %s1262_s4, 48  ;;  %s925_s11 = int_to_ptr.hbm [resolvable:$true] %s924_s11 }
  0x46   : > { %s926_s12 = scalar_lea.hbm %s925_s11, 24  ;;  %p931_p11 = scmp.lt.s32.totalorder %s925_s11, %s1262_s4 }
  0x47   : > { %p927_p1 = scmp.ne.s32.totalorder %s925_s11, %s926_s12  ;;  %p932_p9 = scmp.lt.s32.totalorder %s930_s27, %s926_s12 }
  0x49   : > { %p928_p4 = pnand %p927_p1, %p1146_p7  ;;  %p933_p2 = por %p932_p9, %p931_p11 }
  0x4b   : > { %675 = vmatmul.msk.f32.gmra.mxu0 %vm316_vm0, %v307_v5  ;;  %681 = vmatmul.msk.f32.gmra.mxu1 %vm316_vm0, %v307_v5  ;;  %p929_p8 = pneg %p928_p4 }
  0x4d   : > { %p934_p10 = pnand %p933_p2, %p929_p8 }
  0x53   : > { %676 = vmatmul.msk.f32.gmra.mxu0 %vm316_vm0, %v308_v6  ;;  %682 = vmatmul.msk.f32.gmra.mxu1 %vm316_vm0, %v308_v6 }
  0x5b   : > { %677 = vmatmul.msk.f32.gmra.mxu0 %vm316_vm0, %v309_v7  ;;  %683 = vmatmul.msk.f32.gmra.mxu1 %vm316_vm0, %v309_v7 }
  0x63   : > { %678 = vmatmul.msk.f32.gmra.mxu0 %vm316_vm0, %v310_v8  ;;  %684 = vmatmul.msk.f32.gmra.mxu1 %vm316_vm0, %v310_v8 }
  0x6b   : > { %679 = vmatmul.msk.f32.gmra.mxu0 %vm316_vm0, %v311_v9  ;;  %685 = vmatmul.msk.f32.gmra.mxu1 %vm316_vm0, %v311_v9 }
  0xc0   : > { %v352_v10 = vpop.f32.mrf.mxu0  ;;  %v387_v11 = vpop.f32.mrf.mxu1 }
  0xc8   : > { %v355_v12 = vpop.f32.mrf.mxu0  ;;  %v390_v13 = vpop.f32.mrf.mxu1 }
  0xd0   : > { %v358_v14 = vpop.f32.mrf.mxu0  ;;  %v393_v15 = vpop.f32.mrf.mxu1 }
  0xd8   : > { %v361_v16 = vpop.f32.mrf.mxu0  ;;  %v396_v17 = vpop.f32.mrf.mxu1 }
  0xe0   : > { %v364_v18 = vpop.f32.mrf.mxu0  ;;  %v399_v19 = vpop.f32.mrf.mxu1 }
  0xe8   : > { %v367_v20 = vpop.f32.mrf.mxu0  ;;  %v402_v21 = vpop.f32.mrf.mxu1 }
  0xe9   : > { %428 = vmatpush.msra.mxu2 %v367_v20  ;;  %469 = vmatpush.msra.mxu3 %v402_v21 }
  0xeb   : > { %429 = vmatpush.msra.mxu2 %v364_v18  ;;  %470 = vmatpush.msra.mxu3 %v399_v19 }
  0xed   : > { %430 = vmatpush.msra.mxu2 %v361_v16  ;;  %471 = vmatpush.msra.mxu3 %v396_v17 }
  0xef   : > { %431 = vmatpush.msra.mxu2 %v358_v14  ;;  %472 = vmatpush.msra.mxu3 %v393_v15 }
  0xf1   : > { %432 = vmatpush.msra.mxu2 %v355_v12  ;;  %473 = vmatpush.msra.mxu3 %v390_v13 }
  0xf3   : > { %433 = vmatpush.msra.mxu2 %v352_v10  ;;  %474 = vmatpush.msra.mxu3 %v387_v11 }
  0xf4   : > { %686 = vmatmul.msk.f32.vlgmr.msra.gmra.mxu2 %vm408_vm1, %v405_v22  ;;  %689 = vmatmul.msk.f32.vlgmr.msra.gmra.mxu3 %vm408_vm1, %v447_v23 }
  0xfc   : > { %687 = vmatmul.msk.f32.gmra.mxu2 %vm408_vm1, %v406_v24  ;;  %690 = vmatmul.msk.f32.gmra.mxu3 %vm408_vm1, %v448_v25 }
 0x104   : > { %688 = vmatmul.msk.f32.gmra.mxu2 %vm408_vm1, %v407_v26  ;;  %691 = vmatmul.msk.f32.gmra.mxu3 %vm408_vm1, %v449_v27 }
 0x177   : > { %v435_v28 = vpop.f32.mrf.mxu2  ;;  %v476_v29 = vpop.f32.mrf.mxu3 }
 0x178   : > { %444 = vst [vmem:[%s298_s17] sm:$0xff] %v435_v28 }
 0x179   : > { %485 = vst [vmem:[%s305_s23] sm:$0xff] %v476_v29 }
 0x17f   : > { %v438_v30 = vpop.f32.mrf.mxu2  ;;  %v479_v31 = vpop.f32.mrf.mxu3 }
 0x180   : > { %445 = vst [vmem:[%s298_s17 + $0x8] sm:$0xff] %v438_v30 }
 0x181   : > { %486 = vst [vmem:[%s305_s23 + $0x8] sm:$0xff] %v479_v31 }
 0x187   : > { %v441_v32 = vpop.f32.mrf.mxu2  ;;  %v482_v33 = vpop.f32.mrf.mxu3 }
 0x188   : > { %446 = vst [vmem:[%s298_s17 + $0x10] sm:$0xff] %v441_v32 }
 0x189   : > { %487 = vst [vmem:[%s305_s23 + $0x10] sm:$0xff] %v482_v33 }
 0x18a   : > { %937 = shalt.err (!%p934_p10)
}
 0x18b   : > { %s1025_s17 = smov 128   ;;  %s1026_s23 = smov 8  }
 0x18c   : > { %716 = dma.vmem_to_hbm [thread:$0]  (%p1146_p7), %s507_s8, 384, %s509_s14, %s489_s29, %s1025_s17, %s1025_s17, %s1026_s23  }
 0x18d   : > { %s494_s15 = scalar_lea.sflag [#allocation12], %s1183_s0  ;;  %s952_s16 = sshra.s32 %s1213_s22, 4  ;;  %s953_s16 = int_to_ptr.hbm [resolvable:$true] %s952_s16 }
 0x18e   : > { %s954_s7 = scalar_lea.hbm %s953_s16, 24  ;;  %s958_s24 = scalar_lea.hbm %s1263_s5, 48 }
 0x18f   : > { %p955_p12 = scmp.ne.s32.totalorder %s953_s16, %s954_s7  ;;  %p959_p3 = scmp.lt.s32.totalorder %s953_s16, %s1263_s5 }
 0x190   : > { %p960_p5 = scmp.lt.s32.totalorder %s958_s24, %s954_s7 }
 0x191   : > { %p956_p13 = pnand %p955_p12, %p1146_p7 }
 0x192   : > { %p961_p1 = por %p960_p5, %p959_p3 }
 0x193   : > { %p957_p0 = pneg %p956_p13 }
 0x195   : > { %p962_p4 = pnand %p961_p1, %p957_p0 }
 0x197   : > { %965 = shalt.err (!%p962_p4)
}
 0x198   : > { %717 = dma.vmem_to_hbm [thread:$0]  (%p1146_p7), %s1211_s13, 384, %s1213_s22, %s494_s15, %s1025_s17, %s1025_s17, %s1026_s23  }
 0x199 PF: > { %s540_s0 = sand.u32 1, %s1004_s18   ;;  %p1276_p8 = scmp.ge.s32.totalorder %s1016_s21, 2 }
 0x19a   : > { %s541_s8 = scalar_lea.sflag [#allocation4], %s540_s0 }
 0x19b   : > { %p735_p11 = pnand %p1276_p8, %p1092_p6 }
 0x19d   : > { %p736_p9 = pneg %p735_p11 }
 0x19f   : > { %995 = dma.done.wait (%p736_p9), %s541_s8, 384  }
 0x1a0   : > { %997 = vsyncadd (%p736_p9), %s541_s8, 4294966912  ;;  %s551_s14 = scalar_lea.sflag [#allocation12], %s540_s0 }
 0x1a1   : > { %999 = dma.done.wait (%p736_p9), %s551_s14, 384  }
 0x1a2   : > { %1001 = vsyncadd (%p736_p9), %s551_s14, 4294966912  ;;  %p24_p7 = scmp.ge.s32.totalorder %s1132_s30, 4   ;;  %s1277_s18 = smov %s1008_s19 }
 0x1a3   : > { %s1278_s19 = smov %s1012_s20  ;;  %s1279_s20 = smov %s1142_s9 }
 0x1a4   : > { %s1280_s21 = smov %s1132_s30  ;;  %26 = sbr.rel (!%p24_p7) target bundleno = 11 (0xb), region = 111 }
 0x1a9   :  { %557 = vsyncpa [#allocation3], 1 }
 0x1aa   :  { %559 = vsyncpa [#allocation3 + $0x1], 1 }
 0x1ab   :  { %560 = vsyncpa [#allocation6], 1 }
 0x1ac   :  { %561 = vsyncpa [#allocation9], 1 }
 0x1ad   :  { %563 = vsyncpa [#allocation9 + $0x1], 1 }
 0x1ae   :  { %564 = vsyncpa [#allocation4], 1 }
 0x1af   :  { %566 = vsyncpa [#allocation4 + $0x1], 1 }
 0x1b0   :  { %567 = vsyncpa [#allocation12], 1 }
 0x1b1   :  { %569 = vsyncpa [#allocation12 + $0x1], 1 }

// kernel: tpu_custom_call.1
= control target key start
LH: loop header
LB: loop body
LE: loop exit
PB: predicated region body
PF: predicated region fallthrough
CT: control target
= control target key end

     0   :  { %s1258_s0 = inlined_call_operand.hbm [shape: f32[16,256], index: 0, kind: input, shape index: {}]   ;;  %s1259_s1 = inlined_call_operand.hbm [shape: f32[24,48], index: 1, kind: input, shape index: {}]   ;;  %s1260_s2 = inlined_call_operand.hbm [shape: f32[24,48], index: 2, kind: input, shape index: {}]   ;;  %s1261_s3 = inlined_call_operand.hbm [shape: f32[2,3,16,16], index: 3, kind: input, shape index: {}]   ;;  %s1262_s4 = inlined_call_operand.hbm [shape: f32[2,3,8,128], index: 4, kind: output, shape index: {0}]   ;;  %s1263_s5 = inlined_call_operand.hbm [shape: f32[2,3,8,128], index: 5, kind: output, shape index: {1}]  }
   0x1   :  { %1266 = sst [smem:[#allocation18_spill]] %s1258_s0 }
   0x2   :  { %11 = vsyncpa [#allocation3], 0 }
   0x3   :  { %12 = vsyncpa [#allocation6], 0 }
   0x4   :  { %13 = vsyncpa [#allocation9], 0 }
   0x5   :  { %15 = vsyncpa [#allocation9 + $0x1], 0 }
   0x6   :  { %16 = vsyncpa [#allocation4], 0 }
   0x7   :  { %18 = vsyncpa [#allocation4 + $0x1], 0 }
   0x8   :  { %19 = vsyncpa [#allocation12], 0 }
   0x9   :  { %21 = vsyncpa [#allocation12 + $0x1], 0  ;;  %s1057_s18 = smov 0   ;;  %s1059_s19 = smov 0  }
   0xa   :  { %s1061_s20 = smov 0   ;;  %s1063_s21 = smov 0  }
   0xb LB: > { %s1078_s22 = sadd.s32 4294967295, %s1016_s21   ;;  %s663_s23 = sadd.s32 4294967294, %s1016_s21   ;;  %s1016_s21 = sphi %s1063_s21, %s1280_s21   ;;  %s1012_s20 = sphi %s1061_s20, %s1279_s20   ;;  %s1008_s19 = sphi %s1059_s19, %s1278_s19   ;;  %s1004_s18 = sphi %s1057_s18, %s1277_s18  }
   0xc   : > { %p110_p0 = scmp.ne.s32.totalorder %s1008_s19, %s1004_s18  ;;  %p111_p1 = scmp.eq.s32.totalorder %s1078_s22, 0 }
   0xd   : > { %p134_p2 = scmp.eq.s32.totalorder %s1078_s22, 1  ;;  %p140_p3 = scmp.eq.s32.totalorder %s663_s23, 1 }
   0xe   : > { %p1087_p4 = por %p111_p1, %p110_p0  ;;  %p664_p5 = scmp.ge.s32.totalorder %s1016_s21, 1 }
   0xf   : > { %p1092_p6 = por %p140_p3, %p110_p0  ;;  %p173_p7 = scmp.lt.s32.totalorder %s1016_s21, 3 }
  0x10   : > { %s198_s28 = sshll.u32 %s1259_s1, 4  ;;  %s1018_s30 = smov [#allocation5]   ;;  %s199_s28 = int_to_ptr.hbm [resolvable:$true] %s198_s28 }
  0x11   : > { %p1100_p8 = pnand %p664_p5, %p173_p7  ;;  %s200_s6 = sshll.u32 %s1018_s30, 4  ;;  %s201_s6 = int_to_ptr.vmem [resolvable:$true] %s200_s6 }
  0x12   : > { %s1271_s0 = sld [smem:[#allocation18_spill]]  ;;  %s1264_s11 = smov 128  }
  0x13   : > { %p720_p9 = pneg %p1100_p8  ;;  %s1265_s12 = smov 8  }
  0x14   : > { %s1021_s13 = smov [#allocation2]   ;;  %s1022_s15 = smov 256  }
  0x15   : > { %p1108_p10 = pnand %p720_p9, %p111_p1  ;;  %s186_s14 = sshll.u32 %s1021_s13, 4  ;;  %s187_s14 = int_to_ptr.vmem [resolvable:$true] %s186_s14 }
  0x16   : > { %s1023_s16 = smov 16   ;;  %s212_s26 = sshll.u32 %s1260_s2, 4  ;;  %s213_s26 = int_to_ptr.hbm [resolvable:$true] %s212_s26 }
  0x17   : > { %726 = dma.hbm_to_vmem [thread:$0]  (!%p1108_p10), %s199_s28, 384, %s201_s6, [#allocation6], %s1264_s11, %s1264_s11, %s1265_s12  }
  0x18   : > { %s184_s10 = sshll.u32 %s1271_s0, 4  ;;  %s1024_s27 = smov [#allocation7]   ;;  %s185_s10 = int_to_ptr.hbm [resolvable:$true] %s184_s10 }
  0x19   : > { %723 = dma.hbm_to_vmem [thread:$0]  (!%p1108_p10), %s185_s10, 512, %s187_s14, [#allocation3], %s1022_s15, %s1022_s15, %s1023_s16  }
  0x1a   : > { %s214_s28 = sshll.u32 %s1024_s27, 4  ;;  %s1132_s30 = sadd.s32 1, %s1016_s21   ;;  %s215_s28 = int_to_ptr.vmem [resolvable:$true] %s214_s28 }
  0x1b   : > { %729 = dma.hbm_to_vmem [thread:$0]  (!%p1108_p10), %s213_s26, 384, %s215_s28, [#allocation6], %s1264_s11, %s1264_s11, %s1265_s12  }
  0x1c   : > { %s94_s6 = ssub.s32 %s1016_s21, %s1132_s30  ;;  %s97_s8 = sadd.s32 1, %s1012_s20 }
  0x1d   : > { %p95_p12 = scmp.eq.s32.totalorder %s94_s6, 0  ;;  %p104_p13 = scmp.ne.s32.totalorder %s1012_s20, %s1008_s19 }
  0x1e   : > { %p105_p0 = scmp.eq.s32.totalorder %s1016_s21, 0  ;;  %p744_p3 = scmp.lt.s32.totalorder %s1016_s21, 2 }
  0x1f   : > { %s1142_s9 = scalar_select %p95_p12, %s1012_s20, %s97_s8  }
  0x20   : > { %p106_p5 = por %p105_p0, %p104_p13  ;;  %p1146_p7 = por %p134_p2, %p104_p13 }
  0x21   : > { %s228_s7 = sand.u32 1, %s1012_s20   ;;  %s697_s13 = smul.u32 48, %s1016_s21 }
  0x22   : > { %s696_s14 = smul.u32 48, %s228_s7  ;;  %p1155_p9 = pnand %p744_p3, %p106_p5 }
  0x23   : > { %s237_s17 = scalar_lea.hbm %s1261_s3, %s697_s13  ;;  %s229_s6 = scalar_lea.sflag [#allocation9], %s228_s7 }
  0x24   : > { %s238_s26 = sshll.u32 %s237_s17, 4  ;;  %s232_s27 = scalar_lea.vmem [#allocation8], %s696_s14  ;;  %s239_s26 = int_to_ptr.hbm [resolvable:$true] %s238_s26 }
  0x25   : > { %s240_s28 = sshll.u32 %s232_s27, 4  ;;  %s880_s8 = sshra.s32 %s239_s26, 4  ;;  %s241_s28 = int_to_ptr.vmem [resolvable:$true] %s240_s28  ;;  %s881_s8 = int_to_ptr.hbm [resolvable:$true] %s880_s8 }
  0x26   : > { %s882_s11 = scalar_lea.hbm %s881_s8, 48  ;;  %p884_p10 = pneg %p1155_p9 }
  0x27   : > { %p883_p2 = scmp.ne.s32.totalorder %s881_s8, %s882_s11  ;;  %s887_s16 = scalar_lea.hbm %s1261_s3, 96 }
  0x28   : > { %p888_p0 = scmp.lt.s32.totalorder %s881_s8, %s1261_s3  ;;  %p889_p3 = scmp.lt.s32.totalorder %s887_s16, %s882_s11 }
  0x29   : > { %p885_p12 = pnand %p884_p10, %p883_p2 }
  0x2a   : > { %p890_p5 = por %p889_p3, %p888_p0 }
  0x2b   : > { %p886_p13 = pneg %p885_p12 }
  0x2d   : > { %p891_p11 = pnand %p890_p5, %p886_p13 }
  0x2f   : > { %894 = shalt.err (!%p891_p11)
}
  0x30   : > { %s1274_s7 = smov 8   ;;  %s1275_s14 = smov 128  }
  0x31   : > { %733 = dma.hbm_to_vmem [thread:$0]  (!%p1155_p9), %s239_s26, 768, %s241_s28, %s229_s6, %s1275_s14, %s1275_s14, %s1274_s7  }
  0x32   : > { %252 = sbr.rel (%p1100_p8) target bundleno = 409 (0x199), region = 36 }
  0x37   : > { %983 = dma.done.wait (%p111_p1), [#allocation3], 512  }
  0x38   : > { %985 = vsyncadd (%p111_p1), [#allocation3], 4294966784 }
  0x39   : > { %987 = dma.done.wait (%p111_p1), [#allocation6], 768  }
  0x3a   : > { %989 = vsyncadd (%p111_p1), [#allocation6], 4294966528  ;;  %s1183_s0 = sand.u32 1, %s1008_s19  }
  0x3b   : > { %s698_s29 = smul.u32 48, %s1183_s0  ;;  %s270_s11 = scalar_lea.sflag [#allocation9], %s1183_s0 }
  0x3d   : > { %s273_s12 = scalar_lea.vmem [#allocation8], %s698_s29 }
  0x3e   : > { %991 = dma.done.wait (%p1087_p4), %s270_s11, 768  }
  0x3f   : > { %993 = vsyncadd (%p1087_p4), %s270_s11, 4294966528  ;;  %v314_v0 = vld [vmem:[#allocation2 + $0x10] sm:$0xff]  ;;  %v315_v1 = vld [vmem:[#allocation2 + $0x18] sm:$0xff]  ;;  %vm316_vm0 = vcmask 130048   ;;  %vm408_vm1 = vcmask 392192   ;;  %s699_s24 = smul.u32 24, %s1183_s0 }
  0x40   : > { %v312_v2 = vld [vmem:[#allocation2] sm:$0xff]  ;;  %349 = vmatpush.msra.mxu0 %v314_v0  ;;  %384 = vmatpush.msra.mxu1 %v315_v1  ;;  %v313_v3 = vld [vmem:[#allocation2 + $0x8] sm:$0xff]  ;;  %v447_v23 = vld [vmem:[#allocation7] sm:$0xff]  ;;  %s700_s26 = smul.u32 24, %s1078_s22  ;;  %s489_s29 = scalar_lea.sflag [#allocation4], %s1183_s0 }
  0x41   : > { %v306_v4 = vld [vmem:[%s273_s12] sm:$0xff]  ;;  %v307_v5 = vld [vmem:[%s273_s12 + $0x8] sm:$0xff]  ;;  %v308_v6 = vld [vmem:[%s273_s12 + $0x10] sm:$0xff]  ;;  %s298_s17 = scalar_lea.vmem [#allocation10], %s699_s24  ;;  %s305_s23 = scalar_lea.vmem [#allocation11], %s699_s24 }
  0x42   : > { %350 = vmatpush.msra.mxu0 %v312_v2  ;;  %385 = vmatpush.msra.mxu1 %v313_v3  ;;  %v309_v7 = vld [vmem:[%s273_s12 + $0x18] sm:$0xff]  ;;  %v310_v8 = vld [vmem:[%s273_s12 + $0x20] sm:$0xff]  ;;  %v311_v9 = vld [vmem:[%s273_s12 + $0x28] sm:$0xff]  ;;  %s505_s6 = scalar_lea.hbm %s1262_s4, %s700_s26  ;;  %s506_s8 = sshll.u32 %s298_s17, 4  ;;  %s507_s8 = int_to_ptr.vmem [resolvable:$true] %s506_s8 }
  0x43   : > { %674 = vmatmul.msk.f32.vlgmr.msra.gmra.mxu0 %vm316_vm0, %v306_v4  ;;  %680 = vmatmul.msk.f32.vlgmr.msra.gmra.mxu1 %vm316_vm0, %v306_v4  ;;  %v405_v22 = vld [vmem:[#allocation5] sm:$0xff]  ;;  %v406_v24 = vld [vmem:[#allocation5 + $0x8] sm:$0xff]  ;;  %v407_v26 = vld [vmem:[#allocation5 + $0x10] sm:$0xff]  ;;  %s523_s13 = sshll.u32 %s305_s23, 4  ;;  %s522_s7 = scalar_lea.hbm %s1263_s5, %s700_s26  ;;  %s1211_s13 = int_to_ptr.vmem [resolvable:$true] %s523_s13 }
  0x44   : > { %v448_v25 = vld [vmem:[#allocation7 + $0x8] sm:$0xff]  ;;  %v449_v27 = vld [vmem:[#allocation7 + $0x10] sm:$0xff]  ;;  %s508_s14 = sshll.u32 %s505_s6, 4  ;;  %s525_s22 = sshll.u32 %s522_s7, 4  ;;  %s509_s14 = int_to_ptr.hbm [resolvable:$true] %s508_s14  ;;  %s1213_s22 = int_to_ptr.hbm [resolvable:$true] %s525_s22 }
  0x45   : > { %s924_s11 = sshra.s32 %s509_s14, 4  ;;  %s930_s27 = scalar_lea.hbm %s1262_s4, 48  ;;  %s925_s11 = int_to_ptr.hbm [resolvable:$true] %s924_s11 }
  0x46   : > { %s926_s12 = scalar_lea.hbm %s925_s11, 24  ;;  %p931_p11 = scmp.lt.s32.totalorder %s925_s11, %s1262_s4 }
  0x47   : > { %p927_p1 = scmp.ne.s32.totalorder %s925_s11, %s926_s12  ;;  %p932_p9 = scmp.lt.s32.totalorder %s930_s27, %s926_s12 }
  0x49   : > { %p928_p4 = pnand %p927_p1, %p1146_p7  ;;  %p933_p2 = por %p932_p9, %p931_p11 }
  0x4b   : > { %675 = vmatmul.msk.f32.gmra.mxu0 %vm316_vm0, %v307_v5  ;;  %681 = vmatmul.msk.f32.gmra.mxu1 %vm316_vm0, %v307_v5  ;;  %p929_p8 = pneg %p928_p4 }
  0x4d   : > { %p934_p10 = pnand %p933_p2, %p929_p8 }
  0x53   : > { %676 = vmatmul.msk.f32.gmra.mxu0 %vm316_vm0, %v308_v6  ;;  %682 = vmatmul.msk.f32.gmra.mxu1 %vm316_vm0, %v308_v6 }
  0x5b   : > { %677 = vmatmul.msk.f32.gmra.mxu0 %vm316_vm0, %v309_v7  ;;  %683 = vmatmul.msk.f32.gmra.mxu1 %vm316_vm0, %v309_v7 }
  0x63   : > { %678 = vmatmul.msk.f32.gmra.mxu0 %vm316_vm0, %v310_v8  ;;  %684 = vmatmul.msk.f32.gmra.mxu1 %vm316_vm0, %v310_v8 }
  0x6b   : > { %679 = vmatmul.msk.f32.gmra.mxu0 %vm316_vm0, %v311_v9  ;;  %685 = vmatmul.msk.f32.gmra.mxu1 %vm316_vm0, %v311_v9 }
  0xc0   : > { %v352_v10 = vpop.f32.mrf.mxu0  ;;  %v387_v11 = vpop.f32.mrf.mxu1 }
  0xc8   : > { %v355_v12 = vpop.f32.mrf.mxu0  ;;  %v390_v13 = vpop.f32.mrf.mxu1 }
  0xd0   : > { %v358_v14 = vpop.f32.mrf.mxu0  ;;  %v393_v15 = vpop.f32.mrf.mxu1 }
  0xd8   : > { %v361_v16 = vpop.f32.mrf.mxu0  ;;  %v396_v17 = vpop.f32.mrf.mxu1 }
  0xe0   : > { %v364_v18 = vpop.f32.mrf.mxu0  ;;  %v399_v19 = vpop.f32.mrf.mxu1 }
  0xe8   : > { %v367_v20 = vpop.f32.mrf.mxu0  ;;  %v402_v21 = vpop.f32.mrf.mxu1 }
  0xe9   : > { %428 = vmatpush.msra.mxu2 %v367_v20  ;;  %469 = vmatpush.msra.mxu3 %v402_v21 }
  0xeb   : > { %429 = vmatpush.msra.mxu2 %v364_v18  ;;  %470 = vmatpush.msra.mxu3 %v399_v19 }
  0xed   : > { %430 = vmatpush.msra.mxu2 %v361_v16  ;;  %471 = vmatpush.msra.mxu3 %v396_v17 }
  0xef   : > { %431 = vmatpush.msra.mxu2 %v358_v14  ;;  %472 = vmatpush.msra.mxu3 %v393_v15 }
  0xf1   : > { %432 = vmatpush.msra.mxu2 %v355_v12  ;;  %473 = vmatpush.msra.mxu3 %v390_v13 }
  0xf3   : > { %433 = vmatpush.msra.mxu2 %v352_v10  ;;  %474 = vmatpush.msra.mxu3 %v387_v11 }
  0xf4   : > { %686 = vmatmul.msk.f32.vlgmr.msra.gmra.mxu2 %vm408_vm1, %v405_v22  ;;  %689 = vmatmul.msk.f32.vlgmr.msra.gmra.mxu3 %vm408_vm1, %v447_v23 }
  0xfc   : > { %687 = vmatmul.msk.f32.gmra.mxu2 %vm408_vm1, %v406_v24  ;;  %690 = vmatmul.msk.f32.gmra.mxu3 %vm408_vm1, %v448_v25 }
 0x104   : > { %688 = vmatmul.msk.f32.gmra.mxu2 %vm408_vm1, %v407_v26  ;;  %691 = vmatmul.msk.f32.gmra.mxu3 %vm408_vm1, %v449_v27 }
 0x177   : > { %v435_v28 = vpop.f32.mrf.mxu2  ;;  %v476_v29 = vpop.f32.mrf.mxu3 }
 0x178   : > { %444 = vst [vmem:[%s298_s17] sm:$0xff] %v435_v28 }
 0x179   : > { %485 = vst [vmem:[%s305_s23] sm:$0xff] %v476_v29 }
 0x17f   : > { %v438_v30 = vpop.f32.mrf.mxu2  ;;  %v479_v31 = vpop.f32.mrf.mxu3 }
 0x180   : > { %445 = vst [vmem:[%s298_s17 + $0x8] sm:$0xff] %v438_v30 }
 0x181   : > { %486 = vst [vmem:[%s305_s23 + $0x8] sm:$0xff] %v479_v31 }
 0x187   : > { %v441_v32 = vpop.f32.mrf.mxu2  ;;  %v482_v33 = vpop.f32.mrf.mxu3 }
 0x188   : > { %446 = vst [vmem:[%s298_s17 + $0x10] sm:$0xff] %v441_v32 }
 0x189   : > { %487 = vst [vmem:[%s305_s23 + $0x10] sm:$0xff] %v482_v33 }
 0x18a   : > { %937 = shalt.err (!%p934_p10)
}
 0x18b   : > { %s1025_s17 = smov 128   ;;  %s1026_s23 = smov 8  }
 0x18c   : > { %716 = dma.vmem_to_hbm [thread:$0]  (%p1146_p7), %s507_s8, 384, %s509_s14, %s489_s29, %s1025_s17, %s1025_s17, %s1026_s23  }
 0x18d   : > { %s494_s15 = scalar_lea.sflag [#allocation12], %s1183_s0  ;;  %s952_s16 = sshra.s32 %s1213_s22, 4  ;;  %s953_s16 = int_to_ptr.hbm [resolvable:$true] %s952_s16 }
 0x18e   : > { %s954_s7 = scalar_lea.hbm %s953_s16, 24  ;;  %s958_s24 = scalar_lea.hbm %s1263_s5, 48 }
 0x18f   : > { %p955_p12 = scmp.ne.s32.totalorder %s953_s16, %s954_s7  ;;  %p959_p3 = scmp.lt.s32.totalorder %s953_s16, %s1263_s5 }
 0x190   : > { %p960_p5 = scmp.lt.s32.totalorder %s958_s24, %s954_s7 }
 0x191   : > { %p956_p13 = pnand %p955_p12, %p1146_p7 }
 0x192   : > { %p961_p1 = por %p960_p5, %p959_p3 }
 0x193   : > { %p957_p0 = pneg %p956_p13 }
 0x195   : > { %p962_p4 = pnand %p961_p1, %p957_p0 }
 0x197   : > { %965 = shalt.err (!%p962_p4)
}
 0x198   : > { %717 = dma.vmem_to_hbm [thread:$0]  (%p1146_p7), %s1211_s13, 384, %s1213_s22, %s494_s15, %s1025_s17, %s1025_s17, %s1026_s23  }
 0x199 PF: > { %s540_s0 = sand.u32 1, %s1004_s18   ;;  %p1276_p8 = scmp.ge.s32.totalorder %s1016_s21, 2 }
 0x19a   : > { %s541_s8 = scalar_lea.sflag [#allocation4], %s540_s0 }
 0x19b   : > { %p735_p11 = pnand %p1276_p8, %p1092_p6 }
 0x19d   : > { %p736_p9 = pneg %p735_p11 }
 0x19f   : > { %995 = dma.done.wait (%p736_p9), %s541_s8, 384  }
 0x1a0   : > { %997 = vsyncadd (%p736_p9), %s541_s8, 4294966912  ;;  %s551_s14 = scalar_lea.sflag [#allocation12], %s540_s0 }
 0x1a1   : > { %999 = dma.done.wait (%p736_p9), %s551_s14, 384  }
 0x1a2   : > { %1001 = vsyncadd (%p736_p9), %s551_s14, 4294966912  ;;  %p24_p7 = scmp.ge.s32.totalorder %s1132_s30, 4   ;;  %s1277_s18 = smov %s1008_s19 }
 0x1a3   : > { %s1278_s19 = smov %s1012_s20  ;;  %s1279_s20 = smov %s1142_s9 }
 0x1a4   : > { %s1280_s21 = smov %s1132_s30  ;;  %26 = sbr.rel (!%p24_p7) target bundleno = 11 (0xb), region = 111 }
 0x1a9   :  { %557 = vsyncpa [#allocation3], 1 }
 0x1aa   :  { %559 = vsyncpa [#allocation3 + $0x1], 1 }
 0x1ab   :  { %560 = vsyncpa [#allocation6], 1 }
 0x1ac   :  { %561 = vsyncpa [#allocation9], 1 }
 0x1ad   :  { %563 = vsyncpa [#allocation9 + $0x1], 1 }
 0x1ae   :  { %564 = vsyncpa [#allocation4], 1 }
 0x1af   :  { %566 = vsyncpa [#allocation4 + $0x1], 1 }
 0x1b0   :  { %567 = vsyncpa [#allocation12], 1 }
 0x1b1   :  { %569 = vsyncpa [#allocation12 + $0x1], 1 }

</bundles_post_ra>
